<compile_context>
chip_gen: v6e
topology: v6e:2x2x1
jax: 0.10.0
libtpu: 0.0.40
codegen_flags: <defaults>
</compile_context>

<pallas_src>
import jax
import jax.numpy as jnp
from jax import lax
from jax.experimental import pallas as pl
from jax.experimental.pallas import tpu as pltpu

BN_EPS = 1e-5
LANES = 128


def _ceil_to(x, m):
    return ((x + m - 1) // m) * m


def _pad_channels(c):
    # Lane-dense 128-wide outputs only when the zero-pad is cheap (<= 1.34x);
    # otherwise keep exact channel count (block last dim == full array dim is
    # legal, HBM rows stay compact, no padded-byte writeback).
    return _ceil_to(c, LANES) if c >= 96 else c


# ----------------------------------------------------------------------------
# Pallas kernel: fused stem + downsample0 + downsample1 (one spatial chunk).
# ----------------------------------------------------------------------------
def _fused_kernel(p4_ref, w0_ref, b0_ref, w1_ref, b1_ref, w2_ref, b2_ref,
                  o0_ref, o1_ref, o2_ref):
    s1 = o1_ref.shape[0]          # mid rows in this block
    s2 = o2_ref.shape[0]          # deep rows in this block

    # --- stem: one patch matmul (bf16 x bf16 -> f32 accum), bf16 store ------
    y0 = jnp.dot(p4_ref[...], w0_ref[...], preferred_element_type=jnp.float32)
    o0_ref[...] = (y0 + b0_ref[...]).astype(jnp.bfloat16)

    # --- downsample 0: 4 contiguous quadrant slices read back from the bf16
    #     output ref (bounds the live range of the f32 stem result). ---------
    acc1 = jnp.dot(o0_ref[0:s1, :], w1_ref[0],
                   preferred_element_type=jnp.float32)
    for q in range(1, 4):
        acc1 = acc1 + jnp.dot(o0_ref[q * s1:(q + 1) * s1, :], w1_ref[q],
                              preferred_element_type=jnp.float32)
    o1_ref[...] = (acc1 + b1_ref[...]).astype(jnp.bfloat16)

    # --- downsample 1 --------------------------------------------------------
    acc2 = jnp.dot(o1_ref[0:s2, :], w2_ref[0],
                   preferred_element_type=jnp.float32)
    for q in range(1, 4):
        acc2 = acc2 + jnp.dot(o1_ref[q * s2:(q + 1) * s2, :], w2_ref[q],
                              preferred_element_type=jnp.float32)
    o2_ref[...] = (acc2 + b2_ref[...]).astype(jnp.bfloat16)


# ----------------------------------------------------------------------------
# Host-side glue: tiled parity-major im2col, BN folding, channel padding.
# ----------------------------------------------------------------------------
def _bn_scale_shift(bn):
    s = bn["gamma"] * lax.rsqrt(bn["var"] + BN_EPS)
    t = bn["beta"] - bn["mean"] * s
    return s, t


def _choose_spatial_tiles(n, h4, w4):
    """Number of row-chunks T along the coarsest spatial axis (a//4)."""
    valid = [t for t in range(1, h4 + 1)
             if h4 % t == 0 and ((h4 // t) * w4) % 8 == 0]
    assert valid, "need (H/16)*(W/16) (or a row-chunk of it) divisible by 8"

    def rows(t):                      # shallow rows per grid step
        return 16 * (h4 // t) * w4

    # Large images: max tiles whose shallow block keeps >= 512 rows (HBM
    # roofline sweet spot; blocks stay far under v7x's 64 MiB VMEM).
    cands = [t for t in valid if rows(t) >= 512]
    if cands:
        return max(cands)
    # Small images: maximise pipeline depth (>= 4 grid steps) while keeping
    # blocks >= 64 rows so per-step overhead stays amortised.
    cands = [t for t in valid if rows(t) >= 64 and n * t >= 4]
    if cands:
        return max(cands)
    cands = [t for t in valid if rows(t) >= 64]
    return max(cands) if cands else valid[0]


def _stem_patches_permuted(x_nchw, t_tiles):
    """NCHW -> (N*T*s0_t, 48) bf16 patch matrix.

    Rows grouped by (n, row_chunk) and parity-major inside each chunk:
      (a%2, b%2, (a//2)%2, (b//2)%2, (a//4) within chunk, b//4)
    for stem output pixel (a, b); feature order (kh, kw, c)."""
    N, C, H, W = x_nchw.shape
    h4, w4 = H // 16, W // 16
    h4t = h4 // t_tiles
    # dims: (n, c, tc, ah, a1, a0, kh, bh, b1, b0, kw)
    xr = x_nchw.reshape(N, C, t_tiles, h4t, 2, 2, 4, w4, 2, 2, 4)
    # -> (n, tc, a0, b0, a1, b1, ah, bh, kh, kw, c)   [single fused XLA copy]
    xt = jnp.transpose(xr, (0, 2, 5, 9, 4, 8, 3, 7, 6, 10, 1))
    return xt.reshape(N * t_tiles * 16 * h4t * w4, 16 * C).astype(jnp.bfloat16)


def _stem_folded(p, cout_p):
    """Conv(3,C0,4,4) + post-BN -> (48, cout_p) bf16 weight, (1, cout_p) f32 bias."""
    cout = p["w"].shape[0]
    wmat = jnp.transpose(p["w"], (2, 3, 1, 0)).reshape(-1, cout)   # (48, C0)
    s, t = _bn_scale_shift(p["bn"])
    wf = wmat * s[None, :]
    bf = p["b"] * s + t
    wf = jnp.pad(wf, ((0, 0), (0, cout_p - cout)))
    bf = jnp.pad(bf, (0, cout_p - cout))
    return wf.astype(jnp.bfloat16), bf[None, :].astype(jnp.float32)


def _down_folded(p, cin_p, cout_p):
    """pre-BN + Conv(Cin,Cout,2,2) -> (4, cin_p, cout_p) bf16, (1, cout_p) f32."""
    cout, cin, _, _ = p["w"].shape
    wmat = jnp.transpose(p["w"], (2, 3, 1, 0)).reshape(4 * cin, cout)
    s, t = _bn_scale_shift(p["bn"])
    s_t = jnp.tile(s, 4)                       # patch feature order: c fastest
    t_t = jnp.tile(t, 4)
    wf = wmat * s_t[:, None]                   # (4*Cin, Cout)
    bf = p["b"] + t_t @ wmat                   # (Cout,)
    wf = wf.reshape(4, cin, cout)              # q = 2*kh + kw
    wf = jnp.pad(wf, ((0, 0), (0, cin_p - cin), (0, cout_p - cout)))
    bf = jnp.pad(bf, (0, cout_p - cout))
    return wf.astype(jnp.bfloat16), bf[None, :].astype(jnp.float32)


def _unpermute_shallow(o0, N, T, h4t, w4, c):
    r = o0.reshape(N, T, 2, 2, 2, 2, h4t, w4, o0.shape[-1])[..., :c]
    # (n, tc, a0, b0, a1, b1, ah, bh, ch) -> (n, ch, tc, ah, a1, a0, bh, b1, b0)
    r = jnp.transpose(r, (0, 8, 1, 6, 4, 2, 7, 5, 3))
    return r.reshape(N, c, 4 * T * h4t, 4 * w4)


def _unpermute_mid(o1, N, T, h4t, w4, c):
    r = o1.reshape(N, T, 2, 2, h4t, w4, o1.shape[-1])[..., :c]
    # (n, tc, i0, j0, ih, jh, ch) -> (n, ch, tc, ih, i0, jh, j0)
    r = jnp.transpose(r, (0, 6, 1, 4, 2, 5, 3))
    return r.reshape(N, c, 2 * T * h4t, 2 * w4)


def _unpermute_deep(o2, N, T, h4t, w4, c):
    r = o2.reshape(N, T, h4t, w4, o2.shape[-1])[..., :c]
    return jnp.transpose(r, (0, 4, 1, 2, 3)).reshape(N, c, T * h4t, w4)


def modified_convnext_multiscale(x_nchw, params, out_dtype=jnp.bfloat16):
    """features_only=True, out_indices=[0..4]; returns (shallow, mid, deep) NCHW.

    Outputs are bf16 by default (inference-friendly, halves HBM writeback of
    this mem-bound chain); pass out_dtype=jnp.float32 for f32 features.
    Accumulation is always f32 inside the kernel."""
    c0 = params["stem"]["w"].shape[0]
    c1 = params["downsamples"][0]["w"].shape[0]
    c2 = params["downsamples"][1]["w"].shape[0]
    c0p, c1p, c2p = (_pad_channels(c) for c in (c0, c1, c2))

    N, _, H, W = x_nchw.shape
    assert H % 16 == 0 and W % 16 == 0, "need H, W divisible by 16"
    h4, w4 = H // 16, W // 16
    T = _choose_spatial_tiles(N, h4, w4)
    h4t = h4 // T

    patches = _stem_patches_permuted(x_nchw, T)
    k0 = patches.shape[1]
    s0_t = 16 * h4t * w4          # shallow rows per grid step
    s1_t = s0_t // 4              # mid rows per grid step
    s2_t = s1_t // 4              # deep rows per grid step
    assert s2_t % 8 == 0
    G = N * T                     # grid steps ("parallel": megacore-shardable)

    w0f, b0f = _stem_folded(params["stem"], c0p)
    w1f, b1f = _down_folded(params["downsamples"][0], c0p, c1p)
    w2f, b2f = _down_folded(params["downsamples"][1], c1p, c2p)
    # Note: downsamples[2] is intentionally unused (its output is never returned).

    # HBM traffic / flops hint + VMEM budget derived from the actual blocks.
    blk_bytes = 2 * (s0_t * k0 + s0_t * c0p + s1_t * c1p + s2_t * c2p)  # bf16
    w_bytes = (2 * (k0 * c0p + 4 * c0p * c1p + 4 * c1p * c2p)
               + 4 * (c0p + c1p + c2p))
    flops = G * 2 * (s0_t * k0 * c0p + s0_t * c0p * c1p + s1_t * c1p * c2p)
    cost = pl.CostEstimate(flops=flops, transcendentals=0,
                           bytes_accessed=G * blk_bytes + w_bytes)
    vmem_limit = int(min(max(4 * blk_bytes + 2 * w_bytes + (8 << 20), 32 << 20),
                         48 << 20))

    o0, o1, o2 = pl.pallas_call(
        _fused_kernel,
        out_shape=(jax.ShapeDtypeStruct((G * s0_t, c0p), jnp.bfloat16),
                   jax.ShapeDtypeStruct((G * s1_t, c1p), jnp.bfloat16),
                   jax.ShapeDtypeStruct((G * s2_t, c2p), jnp.bfloat16)),
        grid_spec=pltpu.PrefetchScalarGridSpec(
            num_scalar_prefetch=0,
            grid=(G,),
            in_specs=[
                pl.BlockSpec((s0_t, k0), lambda g: (g, 0)),
                pl.BlockSpec(w0f.shape, lambda g: (0, 0)),
                pl.BlockSpec(b0f.shape, lambda g: (0, 0)),
                pl.BlockSpec(w1f.shape, lambda g: (0, 0, 0)),
                pl.BlockSpec(b1f.shape, lambda g: (0, 0)),
                pl.BlockSpec(w2f.shape, lambda g: (0, 0, 0)),
                pl.BlockSpec(b2f.shape, lambda g: (0, 0)),
            ],
            out_specs=(pl.BlockSpec((s0_t, c0p), lambda g: (g, 0)),
                       pl.BlockSpec((s1_t, c1p), lambda g: (g, 0)),
                       pl.BlockSpec((s2_t, c2p), lambda g: (g, 0))),
        ),
        compiler_params=pltpu.CompilerParams(
            dimension_semantics=("parallel",),
            vmem_limit_bytes=vmem_limit),
        cost_estimate=cost,
    )(patches, w0f, b0f, w1f, b1f, w2f, b2f)

    # Un-permutes run on bf16 data (half the XLA transpose HBM traffic).
    shallow = _unpermute_shallow(o0, N, T, h4t, w4, c0)
    mid = _unpermute_mid(o1, N, T, h4t, w4, c1)
    deep = _unpermute_deep(o2, N, T, h4t, w4, c2)
    if out_dtype is not None:
        shallow, mid, deep = (t.astype(out_dtype) for t in (shallow, mid, deep))
    return shallow, mid, deep


# ----------------------------------------------------------------------------
# Plain-JAX reference (NCHW, lax.conv, f32) for correctness checking.
# ----------------------------------------------------------------------------
def _ref_conv(x, w, b, stride):
    out = lax.conv_general_dilated(
        x, w, (stride, stride), "VALID",
        dimension_numbers=("NCHW", "OIHW", "NCHW"))
    return out + b[None, :, None, None]


def _ref_bn(x, bn):
    s = bn["gamma"] * lax.rsqrt(bn["var"] + BN_EPS)
    t = bn["beta"] - bn["mean"] * s
    return x * s[None, :, None, None] + t[None, :, None, None]


def reference_forward(x, params):
    x = _ref_bn(_ref_conv(x, params["stem"]["w"], params["stem"]["b"], 4),
                params["stem"]["bn"])
    feats = [x]
    for idx in range(4):
        feats.append(x)                       # identity stages
        if idx < 3:
            p = params["downsamples"][idx]
            x = _ref_conv(_ref_bn(x, p["bn"]), p["w"], p["b"], 2)
    return feats[0], feats[len(feats) // 2], feats[-2]


# ----------------------------------------------------------------------------
# Deterministic parameter initialization.
# ----------------------------------------------------------------------------
def init_params(key, base_width):
    widths = [base_width * 2 ** i for i in range(4)]
    keys = iter(jax.random.split(key, 32))

    def conv_params(cin, cout, k):
        w = 0.1 * jax.random.normal(next(keys), (cout, cin, k, k), jnp.float32)
        b = 0.1 * jax.random.normal(next(keys), (cout,), jnp.float32)
        return w, b

    def bn_params(c):
        return dict(
            gamma=1.0 + 0.1 * jax.random.normal(next(keys), (c,), jnp.float32),
            beta=0.1 * jax.random.normal(next(keys), (c,), jnp.float32),
            mean=0.1 * jax.random.normal(next(keys), (c,), jnp.float32),
            var=jax.random.uniform(next(keys), (c,), jnp.float32, 0.5, 1.5),
        )

    w, b = conv_params(3, widths[0], 4)
    params = {"stem": dict(w=w, b=b, bn=bn_params(widths[0])),
              "downsamples": []}
    for idx in range(3):
        w, b = conv_params(widths[idx], widths[idx + 1], 2)
        params["downsamples"].append(
            dict(w=w, b=b, bn=bn_params(widths[idx])))
    return params


if __name__ == "__main__":
    key = jax.random.PRNGKey(0)
    k_x, k_p = jax.random.split(key)

    base_width = 8           # widths = [8, 16, 32, 64]
    batch, in_res = 2, 64    # small resolution consistent with /32 downsampling
    x = jax.random.normal(k_x, (batch, 3, in_res, in_res), jnp.float32)
    params = init_params(k_p, base_width)

    fwd = jax.jit(modified_convnext_multiscale)
    shallow, mid, deep = fwd(x, params)
    jax.block_until_ready((shallow, mid, deep))

    # sanity check against the plain-JAX f32 reference (bf16 path -> loose tol)
    r_shallow, r_mid, r_deep = jax.jit(reference_forward)(x, params)
    for got, ref, name in ((shallow, r_shallow, "shallow"),
                           (mid, r_mid, "mid"),
                           (deep, r_deep, "deep")):
        assert got.shape == ref.shape, (name, got.shape, ref.shape)
        got32 = got.astype(jnp.float32)
        err = float(jnp.max(jnp.abs(got32 - ref)))
        assert jnp.allclose(got32, ref, rtol=5e-2, atol=5e-2), (name, err)

    print("KERNEL_OK")
</pallas_src>

<mosaic_0001>
module attributes {stable_mosaic.version = 11 : i64} {
  func.func @_fused_kernel(%arg0: i32, %arg1: memref<128x48xbf16, #tpu.memory_space<vmem>>, %arg2: memref<48x8xbf16, #tpu.memory_space<vmem>>, %arg3: memref<1x8xf32, #tpu.memory_space<vmem>>, %arg4: memref<4x8x16xbf16, #tpu.memory_space<vmem>>, %arg5: memref<1x16xf32, #tpu.memory_space<vmem>>, %arg6: memref<4x16x32xbf16, #tpu.memory_space<vmem>>, %arg7: memref<1x32xf32, #tpu.memory_space<vmem>>, %arg8: memref<128x8xbf16, #tpu.memory_space<vmem>>, %arg9: memref<32x16xbf16, #tpu.memory_space<vmem>>, %arg10: memref<8x32xbf16, #tpu.memory_space<vmem>>) attributes {dimension_semantics = [#tpu.dimension_semantics<parallel>], iteration_bounds = array<i64: 4>, scalar_prefetch = 0 : i64, scratch_operands = 0 : i64, tpu.core_type = #tpu.core_type<tc>, window_params = [{transform_indices = @transform_0, window_bounds = array<i64: 128, 48>}, {pipeline_mode = #tpu.pipeline_mode<synchronous>, transform_indices = @transform_1, window_bounds = array<i64: 48, 8>}, {pipeline_mode = #tpu.pipeline_mode<synchronous>, transform_indices = @transform_2, window_bounds = array<i64: 1, 8>}, {pipeline_mode = #tpu.pipeline_mode<synchronous>, transform_indices = @transform_3, window_bounds = array<i64: 4, 8, 16>}, {pipeline_mode = #tpu.pipeline_mode<synchronous>, transform_indices = @transform_4, window_bounds = array<i64: 1, 16>}, {pipeline_mode = #tpu.pipeline_mode<synchronous>, transform_indices = @transform_5, window_bounds = array<i64: 4, 16, 32>}, {pipeline_mode = #tpu.pipeline_mode<synchronous>, transform_indices = @transform_6, window_bounds = array<i64: 1, 32>}, {transform_indices = @transform_7, window_bounds = array<i64: 128, 8>}, {transform_indices = @transform_8, window_bounds = array<i64: 32, 16>}, {transform_indices = @transform_9, window_bounds = array<i64: 8, 32>}]} {
    %c0 = arith.constant 0 : index
    %c0_0 = arith.constant 0 : index
    %0 = vector.load %arg1[%c0, %c0_0] : memref<128x48xbf16, #tpu.memory_space<vmem>>, vector<128x48xbf16>
    %c0_1 = arith.constant 0 : index
    %c0_2 = arith.constant 0 : index
    %1 = vector.load %arg2[%c0_1, %c0_2] : memref<48x8xbf16, #tpu.memory_space<vmem>>, vector<48x8xbf16>
    %cst = arith.constant dense<0.000000e+00> : vector<128x8xf32>
    %2 = tpu.matmul %0, %1, %cst {dimension_numbers = #tpu.dot_dimension_numbers<[1], [0], [0], [1], [0, 0, 1, 1], [], []>} : vector<128x48xbf16>, vector<48x8xbf16>, vector<128x8xf32> -> vector<128x8xf32>
    %c0_3 = arith.constant 0 : index
    %c0_4 = arith.constant 0 : index
    %3 = vector.load %arg3[%c0_3, %c0_4] : memref<1x8xf32, #tpu.memory_space<vmem>>, vector<1x8xf32>
    %4 = vector.broadcast %3 : vector<1x8xf32> to vector<128x8xf32>
    %5 = arith.addf %2, %4 : vector<128x8xf32>
    %6 = arith.truncf %5 : vector<128x8xf32> to vector<128x8xbf16>
    %c0_5 = arith.constant 0 : index
    %c0_6 = arith.constant 0 : index
    %7 = vector.load %arg8[%c0_5, %c0_6] : memref<128x8xbf16, #tpu.memory_space<vmem>>, vector<128x8xbf16>
    tpu.vector_store %arg8[%c0_5, %c0_6], %6 {strides = array<i32>} : memref<128x8xbf16, #tpu.memory_space<vmem>>, vector<128x8xbf16>,
    %c0_7 = arith.constant 0 : index
    %c0_8 = arith.constant 0 : index
    %8 = vector.load %arg8[%c0_7, %c0_8] : memref<128x8xbf16, #tpu.memory_space<vmem>>, vector<32x8xbf16>
    %c0_9 = arith.constant 0 : index
    %c0_10 = arith.constant 0 : index
    %c0_11 = arith.constant 0 : index
    %9 = vector.load %arg4[%c0_9, %c0_10, %c0_11] : memref<4x8x16xbf16, #tpu.memory_space<vmem>>, vector<1x8x16xbf16>
    %10 = vector.shape_cast %9 : vector<1x8x16xbf16> to vector<8x16xbf16>
    %cst_12 = arith.constant dense<0.000000e+00> : vector<32x16xf32>
    %11 = tpu.matmul %8, %10, %cst_12 {dimension_numbers = #tpu.dot_dimension_numbers<[1], [0], [0], [1], [0, 0, 1, 1], [], []>} : vector<32x8xbf16>, vector<8x16xbf16>, vector<32x16xf32> -> vector<32x16xf32>
    %c32 = arith.constant 32 : index
    %c0_13 = arith.constant 0 : index
    %12 = vector.load %arg8[%c32, %c0_13] : memref<128x8xbf16, #tpu.memory_space<vmem>>, vector<32x8xbf16>
    %c1 = arith.constant 1 : index
    %c0_14 = arith.constant 0 : index
    %c0_15 = arith.constant 0 : index
    %13 = vector.load %arg4[%c1, %c0_14, %c0_15] : memref<4x8x16xbf16, #tpu.memory_space<vmem>>, vector<1x8x16xbf16>
    %14 = vector.shape_cast %13 : vector<1x8x16xbf16> to vector<8x16xbf16>
    %cst_16 = arith.constant dense<0.000000e+00> : vector<32x16xf32>
    %15 = tpu.matmul %12, %14, %cst_16 {dimension_numbers = #tpu.dot_dimension_numbers<[1], [0], [0], [1], [0, 0, 1, 1], [], []>} : vector<32x8xbf16>, vector<8x16xbf16>, vector<32x16xf32> -> vector<32x16xf32>
    %16 = arith.addf %11, %15 : vector<32x16xf32>
    %c64 = arith.constant 64 : index
    %c0_17 = arith.constant 0 : index
    %17 = vector.load %arg8[%c64, %c0_17] : memref<128x8xbf16, #tpu.memory_space<vmem>>, vector<32x8xbf16>
    %c2 = arith.constant 2 : index
    %c0_18 = arith.constant 0 : index
    %c0_19 = arith.constant 0 : index
    %18 = vector.load %arg4[%c2, %c0_18, %c0_19] : memref<4x8x16xbf16, #tpu.memory_space<vmem>>, vector<1x8x16xbf16>
    %19 = vector.shape_cast %18 : vector<1x8x16xbf16> to vector<8x16xbf16>
    %cst_20 = arith.constant dense<0.000000e+00> : vector<32x16xf32>
    %20 = tpu.matmul %17, %19, %cst_20 {dimension_numbers = #tpu.dot_dimension_numbers<[1], [0], [0], [1], [0, 0, 1, 1], [], []>} : vector<32x8xbf16>, vector<8x16xbf16>, vector<32x16xf32> -> vector<32x16xf32>
    %21 = arith.addf %16, %20 : vector<32x16xf32>
    %c96 = arith.constant 96 : index
    %c0_21 = arith.constant 0 : index
    %22 = vector.load %arg8[%c96, %c0_21] : memref<128x8xbf16, #tpu.memory_space<vmem>>, vector<32x8xbf16>
    %c3 = arith.constant 3 : index
    %c0_22 = arith.constant 0 : index
    %c0_23 = arith.constant 0 : index
    %23 = vector.load %arg4[%c3, %c0_22, %c0_23] : memref<4x8x16xbf16, #tpu.memory_space<vmem>>, vector<1x8x16xbf16>
    %24 = vector.shape_cast %23 : vector<1x8x16xbf16> to vector<8x16xbf16>
    %cst_24 = arith.constant dense<0.000000e+00> : vector<32x16xf32>
    %25 = tpu.matmul %22, %24, %cst_24 {dimension_numbers = #tpu.dot_dimension_numbers<[1], [0], [0], [1], [0, 0, 1, 1], [], []>} : vector<32x8xbf16>, vector<8x16xbf16>, vector<32x16xf32> -> vector<32x16xf32>
    %26 = arith.addf %21, %25 : vector<32x16xf32>
    %c0_25 = arith.constant 0 : index
    %c0_26 = arith.constant 0 : index
    %27 = vector.load %arg5[%c0_25, %c0_26] : memref<1x16xf32, #tpu.memory_space<vmem>>, vector<1x16xf32>
    %28 = vector.broadcast %27 : vector<1x16xf32> to vector<32x16xf32>
    %29 = arith.addf %26, %28 : vector<32x16xf32>
    %30 = arith.truncf %29 : vector<32x16xf32> to vector<32x16xbf16>
    %c0_27 = arith.constant 0 : index
    %c0_28 = arith.constant 0 : index
    %31 = vector.load %arg9[%c0_27, %c0_28] : memref<32x16xbf16, #tpu.memory_space<vmem>>, vector<32x16xbf16>
    tpu.vector_store %arg9[%c0_27, %c0_28], %30 {strides = array<i32>} : memref<32x16xbf16, #tpu.memory_space<vmem>>, vector<32x16xbf16>,
    %c0_29 = arith.constant 0 : index
    %c0_30 = arith.constant 0 : index
    %32 = vector.load %arg9[%c0_29, %c0_30] : memref<32x16xbf16, #tpu.memory_space<vmem>>, vector<8x16xbf16>
    %c0_31 = arith.constant 0 : index
    %c0_32 = arith.constant 0 : index
    %c0_33 = arith.constant 0 : index
    %33 = vector.load %arg6[%c0_31, %c0_32, %c0_33] : memref<4x16x32xbf16, #tpu.memory_space<vmem>>, vector<1x16x32xbf16>
    %34 = vector.shape_cast %33 : vector<1x16x32xbf16> to vector<16x32xbf16>
    %cst_34 = arith.constant dense<0.000000e+00> : vector<8x32xf32>
    %35 = tpu.matmul %32, %34, %cst_34 {dimension_numbers = #tpu.dot_dimension_numbers<[1], [0], [0], [1], [0, 0, 1, 1], [], []>} : vector<8x16xbf16>, vector<16x32xbf16>, vector<8x32xf32> -> vector<8x32xf32>
    %c8 = arith.constant 8 : index
    %c0_35 = arith.constant 0 : index
    %36 = vector.load %arg9[%c8, %c0_35] : memref<32x16xbf16, #tpu.memory_space<vmem>>, vector<8x16xbf16>
    %c1_36 = arith.constant 1 : index
    %c0_37 = arith.constant 0 : index
    %c0_38 = arith.constant 0 : index
    %37 = vector.load %arg6[%c1_36, %c0_37, %c0_38] : memref<4x16x32xbf16, #tpu.memory_space<vmem>>, vector<1x16x32xbf16>
    %38 = vector.shape_cast %37 : vector<1x16x32xbf16> to vector<16x32xbf16>
    %cst_39 = arith.constant dense<0.000000e+00> : vector<8x32xf32>
    %39 = tpu.matmul %36, %38, %cst_39 {dimension_numbers = #tpu.dot_dimension_numbers<[1], [0], [0], [1], [0, 0, 1, 1], [], []>} : vector<8x16xbf16>, vector<16x32xbf16>, vector<8x32xf32> -> vector<8x32xf32>
    %40 = arith.addf %35, %39 : vector<8x32xf32>
    %c16 = arith.constant 16 : index
    %c0_40 = arith.constant 0 : index
    %41 = vector.load %arg9[%c16, %c0_40] : memref<32x16xbf16, #tpu.memory_space<vmem>>, vector<8x16xbf16>
    %c2_41 = arith.constant 2 : index
    %c0_42 = arith.constant 0 : index
    %c0_43 = arith.constant 0 : index
    %42 = vector.load %arg6[%c2_41, %c0_42, %c0_43] : memref<4x16x32xbf16, #tpu.memory_space<vmem>>, vector<1x16x32xbf16>
    %43 = vector.shape_cast %42 : vector<1x16x32xbf16> to vector<16x32xbf16>
    %cst_44 = arith.constant dense<0.000000e+00> : vector<8x32xf32>
    %44 = tpu.matmul %41, %43, %cst_44 {dimension_numbers = #tpu.dot_dimension_numbers<[1], [0], [0], [1], [0, 0, 1, 1], [], []>} : vector<8x16xbf16>, vector<16x32xbf16>, vector<8x32xf32> -> vector<8x32xf32>
    %45 = arith.addf %40, %44 : vector<8x32xf32>
    %c24 = arith.constant 24 : index
    %c0_45 = arith.constant 0 : index
    %46 = vector.load %arg9[%c24, %c0_45] : memref<32x16xbf16, #tpu.memory_space<vmem>>, vector<8x16xbf16>
    %c3_46 = arith.constant 3 : index
    %c0_47 = arith.constant 0 : index
    %c0_48 = arith.constant 0 : index
    %47 = vector.load %arg6[%c3_46, %c0_47, %c0_48] : memref<4x16x32xbf16, #tpu.memory_space<vmem>>, vector<1x16x32xbf16>
    %48 = vector.shape_cast %47 : vector<1x16x32xbf16> to vector<16x32xbf16>
    %cst_49 = arith.constant dense<0.000000e+00> : vector<8x32xf32>
    %49 = tpu.matmul %46, %48, %cst_49 {dimension_numbers = #tpu.dot_dimension_numbers<[1], [0], [0], [1], [0, 0, 1, 1], [], []>} : vector<8x16xbf16>, vector<16x32xbf16>, vector<8x32xf32> -> vector<8x32xf32>
    %50 = arith.addf %45, %49 : vector<8x32xf32>
    %c0_50 = arith.constant 0 : index
    %c0_51 = arith.constant 0 : index
    %51 = vector.load %arg7[%c0_50, %c0_51] : memref<1x32xf32, #tpu.memory_space<vmem>>, vector<1x32xf32>
    %52 = vector.broadcast %51 : vector<1x32xf32> to vector<8x32xf32>
    %53 = arith.addf %50, %52 : vector<8x32xf32>
    %54 = arith.truncf %53 : vector<8x32xf32> to vector<8x32xbf16>
    %c0_52 = arith.constant 0 : index
    %c0_53 = arith.constant 0 : index
    %55 = vector.load %arg10[%c0_52, %c0_53] : memref<8x32xbf16, #tpu.memory_space<vmem>>, vector<8x32xbf16>
    tpu.vector_store %arg10[%c0_52, %c0_53], %54 {strides = array<i32>} : memref<8x32xbf16, #tpu.memory_space<vmem>>, vector<8x32xbf16>,
    return
  }
  func.func @transform_0(%arg0: i32) -> (i32, i32) {
    %c0_i32 = arith.constant 0 : i32
    %c0_i32_0 = arith.constant 0 : i32
    return %arg0, %c0_i32 : i32, i32
  }
  func.func @transform_1(%arg0: i32) -> (i32, i32) {
    %c0_i32 = arith.constant 0 : i32
    %c0_i32_0 = arith.constant 0 : i32
    %c0_i32_1 = arith.constant 0 : i32
    return %c0_i32, %c0_i32_0 : i32, i32
  }
  func.func @transform_2(%arg0: i32) -> (i32, i32) {
    %c0_i32 = arith.constant 0 : i32
    %c0_i32_0 = arith.constant 0 : i32
    %c0_i32_1 = arith.constant 0 : i32
    return %c0_i32, %c0_i32_0 : i32, i32
  }
  func.func @transform_3(%arg0: i32) -> (i32, i32, i32) {
    %c0_i32 = arith.constant 0 : i32
    %c0_i32_0 = arith.constant 0 : i32
    %c0_i32_1 = arith.constant 0 : i32
    %c0_i32_2 = arith.constant 0 : i32
    return %c0_i32, %c0_i32_0, %c0_i32_1 : i32, i32, i32
  }
  func.func @transform_4(%arg0: i32) -> (i32, i32) {
    %c0_i32 = arith.constant 0 : i32
    %c0_i32_0 = arith.constant 0 : i32
    %c0_i32_1 = arith.constant 0 : i32
    return %c0_i32, %c0_i32_0 : i32, i32
  }
  func.func @transform_5(%arg0: i32) -> (i32, i32, i32) {
    %c0_i32 = arith.constant 0 : i32
    %c0_i32_0 = arith.constant 0 : i32
    %c0_i32_1 = arith.constant 0 : i32
    %c0_i32_2 = arith.constant 0 : i32
    return %c0_i32, %c0_i32_0, %c0_i32_1 : i32, i32, i32
  }
  func.func @transform_6(%arg0: i32) -> (i32, i32) {
    %c0_i32 = arith.constant 0 : i32
    %c0_i32_0 = arith.constant 0 : i32
    %c0_i32_1 = arith.constant 0 : i32
    return %c0_i32, %c0_i32_0 : i32, i32
  }
  func.func @transform_7(%arg0: i32) -> (i32, i32) {
    %c0_i32 = arith.constant 0 : i32
    %c0_i32_0 = arith.constant 0 : i32
    return %arg0, %c0_i32 : i32, i32
  }
  func.func @transform_8(%arg0: i32) -> (i32, i32) {
    %c0_i32 = arith.constant 0 : i32
    %c0_i32_0 = arith.constant 0 : i32
    return %arg0, %c0_i32 : i32, i32
  }
  func.func @transform_9(%arg0: i32) -> (i32, i32) {
    %c0_i32 = arith.constant 0 : i32
    %c0_i32_0 = arith.constant 0 : i32
    return %arg0, %c0_i32 : i32, i32
  }
}

</mosaic_0001>

<bundles_post_ra>
// kernel: tile.27
= control target key start
LH: loop header
LB: loop body
LE: loop exit
PB: predicated region body
PF: predicated region fallthrough
CT: control target
= control target key end

     0   :  { %s22_s0 = inlined_call_operand.vmem [shape: f32[8], index: 0, kind: input, shape index: {}]   ;;  %s23_s1 = inlined_call_operand.vmem [shape: f32[4,8], index: 1, kind: output, shape index: {}]  }
   0x1   :  { %v4_v0 = vld [vmem:[%s22_s0] ss:$0 sm:$0xff] }
   0x2   :  { %5 = vst [vmem:[%s23_s1] sm:$0xf] %v4_v0 }

// kernel: tile.28
= control target key start
LH: loop header
LB: loop body
LE: loop exit
PB: predicated region body
PF: predicated region fallthrough
CT: control target
= control target key end

     0   :  { %vm8_vm0 = vcmask 64512   ;;  %s40_s8 = smov 8   ;;  %s41_s9 = smov 16   ;;  %vm14_vm1 = vcmask 261312   ;;  %vm20_vm2 = vcmask 195712   ;;  %vm26_vm3 = vcmask 130112   ;;  %s58_s0 = inlined_call_operand.vmem [shape: f32[4,8], index: 0, kind: input, shape index: {}]   ;;  %s59_s1 = inlined_call_operand.vmem [shape: f32[32], index: 1, kind: output, shape index: {}]  }
   0x1   :  { %v5_v0 = vld [vmem:[%s58_s0] sm:$0xf]  ;;  %s39_s0 = smov 24  }
   0x2   :  { %6 = vst [vmem:[#allocation1] sm:$0xf] %v5_v0 }
   0x9   :  { %v11_v1 = vld [vmem:[#allocation1 + $0x3] sm:$0x1]   ;;  %v23_v2 = vld [vmem:[#allocation1 + $0x1] sm:$0x1]   ;;  %v7_v3 = vld [vmem:[#allocation1] sm:$0x1]  }
   0xa   :  { %12 = vrot.lane.b32.xlu0 %v11_v1, %s39_s0  ;;  %24 = vrot.lane.b32.xlu1 %v23_v2, %s40_s8  ;;  %v17_v4 = vld [vmem:[#allocation1 + $0x2] sm:$0x1]   ;;  %9 = vst.msk [vmem:[#allocation0] sm:$0x1] %vm8_vm0, %v7_v3  }
   0xe   :  { %18 = vrot.lane.b32.xlu0 %v17_v4, %s41_s9 }
  0x7c   :  { %v13_v5 = vpop.permute.xlu0 %12   ;;  %v25_v6 = vpop.permute.xlu1 %24  }
  0x7d   :  { %15 = vst.msk [vmem:[#allocation0] sm:$0x1] %vm14_vm1, %v13_v5  }
  0x80   :  { %v19_v7 = vpop.permute.xlu0 %18  }
  0x81   :  { %21 = vst.msk [vmem:[#allocation0] sm:$0x1] %vm20_vm2, %v19_v7  }
  0x82   :  { %27 = vst.msk [vmem:[#allocation0] sm:$0x1] %vm26_vm3, %v25_v6  }
  0x89   :  { %v32_v8 = vld [vmem:[#allocation0] sm:$0x1] }
  0x8a   :  { %35 = vst [vmem:[%s59_s1] sm:$0x1] %v32_v8 }

// kernel: tile.37
= control target key start
LH: loop header
LB: loop body
LE: loop exit
PB: predicated region body
PF: predicated region fallthrough
CT: control target
= control target key end

     0   :  { %s22_s0 = inlined_call_operand.vmem [shape: f32[16], index: 0, kind: input, shape index: {}]   ;;  %s23_s1 = inlined_call_operand.vmem [shape: f32[4,16], index: 1, kind: output, shape index: {}]  }
   0x1   :  { %v4_v0 = vld [vmem:[%s22_s0] ss:$0 sm:$0xff] }
   0x2   :  { %5 = vst [vmem:[%s23_s1] sm:$0xf] %v4_v0 }

// kernel: tile.38
= control target key start
LH: loop header
LB: loop body
LE: loop exit
PB: predicated region body
PF: predicated region fallthrough
CT: control target
= control target key end

     0   :  { %vm8_vm0 = vcmask 130048   ;;  %s40_s8 = smov 16   ;;  %s41_s9 = smov 32   ;;  %vm14_vm1 = vcmask 523648   ;;  %vm20_vm2 = vcmask 392448   ;;  %vm26_vm3 = vcmask 261248   ;;  %s58_s0 = inlined_call_operand.vmem [shape: f32[4,16], index: 0, kind: input, shape index: {}]   ;;  %s59_s1 = inlined_call_operand.vmem [shape: f32[64], index: 1, kind: output, shape index: {}]  }
   0x1   :  { %v5_v0 = vld [vmem:[%s58_s0] sm:$0xf]  ;;  %s39_s0 = smov 48  }
   0x2   :  { %6 = vst [vmem:[#allocation1] sm:$0xf] %v5_v0 }
   0x9   :  { %v11_v1 = vld [vmem:[#allocation1 + $0x3] sm:$0x1]   ;;  %v23_v2 = vld [vmem:[#allocation1 + $0x1] sm:$0x1]   ;;  %v7_v3 = vld [vmem:[#allocation1] sm:$0x1]  }
   0xa   :  { %12 = vrot.lane.b32.xlu0 %v11_v1, %s39_s0  ;;  %24 = vrot.lane.b32.xlu1 %v23_v2, %s40_s8  ;;  %v17_v4 = vld [vmem:[#allocation1 + $0x2] sm:$0x1]   ;;  %9 = vst.msk [vmem:[#allocation0] sm:$0x1] %vm8_vm0, %v7_v3  }
   0xe   :  { %18 = vrot.lane.b32.xlu0 %v17_v4, %s41_s9 }
  0x7c   :  { %v13_v5 = vpop.permute.xlu0 %12   ;;  %v25_v6 = vpop.permute.xlu1 %24  }
  0x7d   :  { %15 = vst.msk [vmem:[#allocation0] sm:$0x1] %vm14_vm1, %v13_v5  }
  0x80   :  { %v19_v7 = vpop.permute.xlu0 %18  }
  0x81   :  { %21 = vst.msk [vmem:[#allocation0] sm:$0x1] %vm20_vm2, %v19_v7  }
  0x82   :  { %27 = vst.msk [vmem:[#allocation0] sm:$0x1] %vm26_vm3, %v25_v6  }
  0x89   :  { %v32_v8 = vld [vmem:[#allocation0] sm:$0x1] }
  0x8a   :  { %35 = vst [vmem:[%s59_s1] sm:$0x1] %v32_v8 }

// kernel: modified_convnext_multiscale.1
= control target key start
LH: loop header
LB: loop body
LE: loop exit
PB: predicated region body
PF: predicated region fallthrough
CT: control target
= control target key end

     0   :  { %15 = vsyncpa [#allocation3], 0  ;;  %s2000_s0 = inlined_call_operand.vmem [shape: bf16[512,48], index: 0, kind: input, shape index: {}]   ;;  %s2001_s1 = inlined_call_operand.vmem [shape: bf16[48,8], index: 1, kind: input, shape index: {}]   ;;  %s2002_s2 = inlined_call_operand.vmem [shape: f32[1,8], index: 2, kind: input, shape index: {}]   ;;  %s2003_s3 = inlined_call_operand.vmem [shape: bf16[4,8,16], index: 3, kind: input, shape index: {}]   ;;  %s2004_s4 = inlined_call_operand.vmem [shape: f32[1,16], index: 4, kind: input, shape index: {}]   ;;  %s2005_s5 = inlined_call_operand.vmem [shape: bf16[4,16,32], index: 5, kind: input, shape index: {}]   ;;  %s2006_s6 = inlined_call_operand.vmem [shape: f32[1,32], index: 6, kind: input, shape index: {}]   ;;  %s2007_s7 = inlined_call_operand.vmem [shape: bf16[512,8], index: 7, kind: output, shape index: {0}]   ;;  %s2008_s8 = inlined_call_operand.vmem [shape: bf16[128,16], index: 8, kind: output, shape index: {1}]   ;;  %s2009_s9 = inlined_call_operand.hbm [shape: bf16[32,32], index: 9, kind: output, shape index: {2}]  }
   0x1   :  { %17 = vsyncpa [#allocation3 + $0x1], 0  ;;  %s1748_s30 = smov 0   ;;  %s1750_s10 = smov 0  }
   0x2   :  { %s1752_s11 = smov 0   ;;  %s1754_s12 = smov 0  }
   0x3 LB: > { %s1769_s13 = sadd.s32 4294967295, %s1693_s12   ;;  %s1354_s14 = sadd.s32 4294967294, %s1693_s12   ;;  %s1693_s12 = sphi %s1754_s12, %s2015_s12   ;;  %s1689_s11 = sphi %s1752_s11, %s2014_s11   ;;  %s1685_s10 = sphi %s1750_s10, %s2013_s10   ;;  %s1681_s30 = sphi %s1748_s30, %s2012_s30  }
   0x4   : > { %s1773_s15 = sadd.s32 1, %s1693_s12   ;;  %s234_s16 = sadd.s32 1, %s1689_s11 }
   0x5   : > { %s231_s17 = ssub.s32 %s1693_s12, %s1773_s15  ;;  %p244_p0 = scmp.ne.s32.totalorder %s1689_s11, %s1685_s10 }
   0x6   : > { %p232_p1 = scmp.eq.s32.totalorder %s231_s17, 0  ;;  %p245_p2 = scmp.eq.s32.totalorder %s1769_s13, 3 }
   0x7   : > { %p250_p3 = scmp.ne.s32.totalorder %s1685_s10, %s1681_s30  ;;  %p251_p4 = scmp.eq.s32.totalorder %s1354_s14, 3 }
   0x8   : > { %s1784_s18 = scalar_select %p232_p1, %s1689_s11, %s234_s16  }
   0x9   : > { %p1786_p5 = por %p245_p2, %p244_p0  ;;  %p1790_p6 = por %p251_p4, %p250_p3 }
   0xa   : > { %p1357_p7 = scmp.ge.s32.totalorder %s1693_s12, 1  ;;  %p296_p8 = scmp.lt.s32.totalorder %s1693_s12, 5 }
   0xc   : > { %p297_p9 = pnand %p1357_p7, %p296_p8 }
   0xd   : > { %s1359_s23 = sshll.u32 (!%p297_p9), %s1769_s13, 4  ;;  %s1363_s26 = sshll.u32 (!%p297_p9), %s1769_s13, 2 }
   0xe   : > { %300 = sbr.rel (%p297_p9) target bundleno = 711 (0x2c7), region = 48  ;;  %p343_p10 = scmp.lt.s32.totalorder (!%p297_p9), %s1359_s23, 63 }
   0xf   : > { %p355_p11 = scmp.lt.s32.totalorder (!%p297_p9), %s1363_s26, 15  ;;  %s339_s25 = sand.u32 (!%p297_p9), 1, %s1685_s10  }
  0x10   : > { %s1224_s22 = scalar_lea.sflag (!%p297_p9), [#allocation3], %s339_s25  ;;  %s1697_s27 = smov (!%p297_p9), [#allocation2]  }
  0x13   : > { %v1610_v0 = vld [vmem:[%s2001_s1 + $0x10] sm:$0xff]   ;;  %v1611_v1 = vld [vmem:[%s2001_s1 + $0x8] sm:$0xff]   ;;  %v1612_v2 = vld [vmem:[%s2001_s1] sm:$0xff]   ;;  %s2017_s23 = smov (!%p343_p10, %s1359_s23), 63  ;;  %vm448_vm0 = vcmask 392192   ;;  %vm679_vm1 = vcmask 1043456  }
  0x14   : > { %1495 = vmatprep.subr.bf16.mxu0 %v1610_v0  ;;  %s1360_s28 = sshll.u32 %s2017_s23, 2  ;;  %v1401_v11 = vld [vmem:[%s2003_s3 + $0x4] sm:$0xf]  ;;  %v655_v13 = vld [vmem:[%s2003_s3] sm:$0xf]  ;;  %vm634_vm2 = vcmask 60416  }
  0x15   : > { %1496 = vmatpush3.bf16.msra.mxu0 %v1610_v0  ;;  %s346_s16 = scalar_lea.vmem %s2000_s0, %s1360_s28  ;;  %1565 = vmatprep.subr.msk.bf16.mxu1 %vm679_vm1, %v1401_v11  ;;  %v681_v12 = vsel %vm679_vm1, %v1401_v11, 0  ;;  %v1834_v14 = vld [vmem:[%s2002_s2] ss:$0 sm:$0xff]  ;;  %s1842_s14 = scalar_lea.vmem %s2007_s7, %s1360_s28  ;;  %vm672_vm3 = vcmask 64512   ;;  %v749_v58 = vsel %vm679_vm1, %v655_v13, 0  ;;  %vm1696_vm4 = vmmov 0  }
  0x16   : > { %1497 = vmatprep.subr.bf16.mxu0 %v1611_v1  ;;  %v1613_v3 = vld [vmem:[%s346_s16] sm:$0xff]   ;;  %v1614_v4 = vld [vmem:[%s346_s16 + $0x8] sm:$0xff]   ;;  %v1615_v5 = vld [vmem:[%s346_s16 + $0x10] sm:$0xff]   ;;  %1518 = vmatpush3.bf16.msra.mxu1 %v681_v12  ;;  %s2019_s26 = smov (!%p355_p11, %s1363_s26), 15  ;;  %vm983_vm5 = vcmask 125952   ;;  %vm1001_vm6 = vcmask 130048  }
  0x17   : > { %1501 = vmatprep.mubr.msk.bf16.mxu0 %vm448_vm0, %v1613_v3  ;;  %v1616_v6 = vld [vmem:[%s346_s16 + $0x18] sm:$0xff]   ;;  %v1617_v7 = vld [vmem:[%s346_s16 + $0x20] sm:$0xff]   ;;  %v1618_v8 = vld [vmem:[%s346_s16 + $0x28] sm:$0xff]   ;;  %1566 = vmatprep.subr.msk.bf16.mxu1 %vm679_vm1, %v655_v13  ;;  %v1695_v13 = vmov 0.0   ;;  %vm1211_vm7 = vcmask 257024  }
  0x18   : > { %v1619_v9 = vld [vmem:[%s346_s16 + $0x30] sm:$0xff]   ;;  %v1620_v10 = vld [vmem:[%s346_s16 + $0x38] sm:$0xff]   ;;  %v1410_v61 = vld [vmem:[%s2003_s3 + $0x8] sm:$0xf] }
  0x19   : > { %1498 = vmatpush3.bf16.msra.mxu0 %v1611_v1  ;;  %v1629_v12 = vld [vmem:[%s2005_s5] sm:$0xff]  }
  0x1a   : > { %1499 = vmatprep.subr.bf16.mxu0 %v1612_v2 }
  0x1d   : > { %1500 = vmatpush3.bf16.msra.mxu0 %v1612_v2 }
  0x1e   : > { %1547 = vmatprep.subr.bf16.mxu0 %v1695_v13 }
  0x20   : > { %1502 = vmatmul.mubr.msk.bf16.vlgmr.msra.gmra.mxu0 %vm448_vm0, %v1614_v4 }
  0x21   : > { %1505 = vmatprep.mubr.msk.bf16.mxu0 %vm448_vm0, %v1615_v5  ;;  %1548 = vmatpush3.bf16.msra.mxu0 %v1629_v12 }
  0x22   : > { %1559 = vmatprep.subr.bf16.mxu0 %v1695_v13 }
  0x28   : > { %1506 = vmatmul.mubr.msk.bf16.gmra.mxu0 %vm448_vm0, %v1616_v6  ;;  %v823_v6 = vsel %vm679_vm1, %v1410_v61, 0 }
  0x29   : > { %1509 = vmatprep.mubr.msk.bf16.mxu0 %vm448_vm0, %v1617_v7  ;;  %v1415_v7 = vld [vmem:[%s2003_s3 + $0xc] sm:$0xf] }
  0x30   : > { %1510 = vmatmul.mubr.msk.bf16.gmra.mxu0 %vm448_vm0, %v1618_v8 }
  0x31   : > { %1513 = vmatprep.mubr.msk.bf16.mxu0 %vm448_vm0, %v1619_v9 }
  0x38   : > { %1514 = vmatmul.mubr.msk.bf16.gmra.mxu0 %vm448_vm0, %v1620_v10  ;;  %v901_v10 = vsel %vm679_vm1, %v1415_v7, 0 }
  0x39   : > { %1549 = vmatprep.mubr.msk.bf16.mxu0 %vm1696_vm4, %v1695_v13 }
  0xe0   : > { %v1503_v15 = vpop.f32.mrf.mxu0 }
  0xe1   : > { %v516_v16 = vadd.f32 %v1503_v15, %v1834_v14 }
  0xe2   : > { %v507_v17 = vpop.f32.mrf.mxu0 }
  0xe3   : > { %v1446_v18 = vpack.c.bf16 %v516_v16, %v516_v16  ;;  %v508_v19 = vadd.f32 %v1834_v14, %v507_v17 }
  0xe4   : > { %v1504_v20 = vpop.f32.mrf.mxu0 }
  0xe5   : > { %637 = vst.msk [vmem:[%s1842_s14 + $0x8] sm:$0xf] %vm634_vm2, %v1446_v18  ;;  %v1444_v21 = vpack.c.bf16 %v508_v19, %v508_v19  ;;  %v519_v22 = vadd.f32 %v1504_v20, %v1834_v14 }
  0xe6   : > { %v510_v23 = vpop.f32.mrf.mxu0 }
  0xe7   : > { %635 = vst.msk [vmem:[%s1842_s14] sm:$0xf] %vm634_vm2, %v1444_v21  ;;  %v1447_v24 = vpack.c.bf16 %v519_v22, %v519_v22  ;;  %v511_v25 = vadd.f32 %v1834_v14, %v510_v23 }
  0xe8   : > { %v1507_v26 = vpop.f32.mrf.mxu0 }
  0xe9   : > { %638 = vst.msk [vmem:[%s1842_s14 + $0xc] sm:$0xf] %vm634_vm2, %v1447_v24  ;;  %v1445_v27 = vpack.c.bf16 %v511_v25, %v511_v25  ;;  %v532_v28 = vadd.f32 %v1507_v26, %v1834_v14 }
  0xea   : > { %v523_v29 = vpop.f32.mrf.mxu0 }
  0xeb   : > { %636 = vst.msk [vmem:[%s1842_s14 + $0x4] sm:$0xf] %vm634_vm2, %v1445_v27  ;;  %v1450_v30 = vpack.c.bf16 %v532_v28, %v532_v28  ;;  %v524_v31 = vadd.f32 %v1834_v14, %v523_v29 }
  0xec   : > { %v1508_v32 = vpop.f32.mrf.mxu0 }
  0xed   : > { %641 = vst.msk [vmem:[%s1842_s14 + $0x18] sm:$0xf] %vm634_vm2, %v1450_v30  ;;  %v1448_v33 = vpack.c.bf16 %v524_v31, %v524_v31  ;;  %v535_v34 = vadd.f32 %v1508_v32, %v1834_v14  ;;  %v1420_v31 = vld [vmem:[%s2004_s4] ss:$0 sm:$0xff] }
  0xee   : > { %v526_v35 = vpop.f32.mrf.mxu0 }
  0xef   : > { %639 = vst.msk [vmem:[%s1842_s14 + $0x10] sm:$0xf] %vm634_vm2, %v1448_v33  ;;  %v1451_v36 = vpack.c.bf16 %v535_v34, %v535_v34  ;;  %v527_v37 = vadd.f32 %v1834_v14, %v526_v35 }
  0xf0   : > { %v1511_v38 = vpop.f32.mrf.mxu0  ;;  %v1624_v5 = vld [vmem:[%s1842_s14 + $0x8] sm:$0xff]  }
  0xf1   : > { %642 = vst.msk [vmem:[%s1842_s14 + $0x1c] sm:$0xf] %vm634_vm2, %v1451_v36  ;;  %v1449_v39 = vpack.c.bf16 %v527_v37, %v527_v37  ;;  %v548_v40 = vadd.f32 %v1511_v38, %v1834_v14 }
  0xf2   : > { %v539_v41 = vpop.f32.mrf.mxu0  ;;  %v1623_v60 = vld [vmem:[%s1842_s14] sm:$0xff]  }
  0xf3   : > { %640 = vst.msk [vmem:[%s1842_s14 + $0x14] sm:$0xf] %vm634_vm2, %v1449_v39  ;;  %v1454_v42 = vpack.c.bf16 %v548_v40, %v548_v40  ;;  %v540_v43 = vadd.f32 %v1834_v14, %v539_v41 }
  0xf4   : > { %v1512_v44 = vpop.f32.mrf.mxu0 }
  0xf5   : > { %645 = vst.msk [vmem:[%s1842_s14 + $0x28] sm:$0xf] %vm634_vm2, %v1454_v42  ;;  %v1452_v45 = vpack.c.bf16 %v540_v43, %v540_v43  ;;  %v551_v46 = vadd.f32 %v1512_v44, %v1834_v14 }
  0xf6   : > { %v542_v47 = vpop.f32.mrf.mxu0 }
  0xf7   : > { %643 = vst.msk [vmem:[%s1842_s14 + $0x20] sm:$0xf] %vm634_vm2, %v1452_v45  ;;  %v1455_v48 = vpack.c.bf16 %v551_v46, %v551_v46  ;;  %v543_v49 = vadd.f32 %v1834_v14, %v542_v47 }
  0xf8   : > { %v1515_v50 = vpop.f32.mrf.mxu0  ;;  %v1622_v57 = vld [vmem:[%s1842_s14 + $0x18] sm:$0xff]  }
  0xf9   : > { %646 = vst.msk [vmem:[%s1842_s14 + $0x2c] sm:$0xf] %vm634_vm2, %v1455_v48  ;;  %v1453_v51 = vpack.c.bf16 %v543_v49, %v543_v49  ;;  %v564_v52 = vadd.f32 %v1515_v50, %v1834_v14 }
  0xfa   : > { %v555_v53 = vpop.f32.mrf.mxu0  ;;  %v1621_v54 = vld [vmem:[%s1842_s14 + $0x10] sm:$0xff]  }
  0xfb   : > { %644 = vst.msk [vmem:[%s1842_s14 + $0x24] sm:$0xf] %vm634_vm2, %v1453_v51  ;;  %v1458_v55 = vpack.c.bf16 %v564_v52, %v564_v52  ;;  %v556_v56 = vadd.f32 %v1834_v14, %v555_v53  ;;  %1519 = vmatprep.mubr.msk.bf16.mxu1 %vm672_vm3, %v1621_v54  ;;  %v1632_v52 = vld [vmem:[%s2005_s5 + $0x18] sm:$0xff]   ;;  %v1631_v54 = vld [vmem:[%s2005_s5 + $0x10] sm:$0xff]  }
  0xfc   : > { %v1516_v59 = vpop.f32.mrf.mxu0  ;;  %1520 = vmatmul.mubr.msk.bf16.vlgmr.msra.gmra.mxu1 %vm672_vm3, %v1622_v57 }
  0xfd   : > { %649 = vst.msk [vmem:[%s1842_s14 + $0x38] sm:$0xf] %vm634_vm2, %v1458_v55  ;;  %v1456_v62 = vpack.c.bf16 %v556_v56, %v556_v56  ;;  %v567_v63 = vadd.f32 %v1516_v59, %v1834_v14  ;;  %1524 = vmatpush3.bf16.msra.mxu1 %v749_v58  ;;  %1525 = vmatprep.mubr.msk.bf16.mxu1 %vm672_vm3, %v1623_v60 }
  0xfe   : > { %v558_v0 = vpop.f32.mrf.mxu0  ;;  %1567 = vmatprep.subr.msk.bf16.mxu1 %vm679_vm1, %v1410_v61 }
  0xff   : > { %647 = vst.msk [vmem:[%s1842_s14 + $0x30] sm:$0xf] %vm634_vm2, %v1456_v62  ;;  %v1459_v1 = vpack.c.bf16 %v567_v63, %v567_v63  ;;  %v559_v2 = vadd.f32 %v1834_v14, %v558_v0  ;;  %v1630_v14 = vld [vmem:[%s2005_s5 + $0x8] sm:$0xff]  }
 0x100   : > { %v1626_v9 = vld [vmem:[%s1842_s14 + $0x28] sm:$0xff]  }
 0x101   : > { %650 = vst.msk [vmem:[%s1842_s14 + $0x3c] sm:$0xf] %vm634_vm2, %v1459_v1  ;;  %v1457_v3 = vpack.c.bf16 %v559_v2, %v559_v2 }
 0x102   : > { %v1625_v4 = vld [vmem:[%s1842_s14 + $0x20] sm:$0xff]  }
 0x103   : > { %648 = vst.msk [vmem:[%s1842_s14 + $0x34] sm:$0xf] %vm634_vm2, %v1457_v3 }
 0x104   : > { %1526 = vmatmul.mubr.msk.bf16.vlgmr.msra.gmra.mxu1 %vm672_vm3, %v1624_v5 }
 0x105   : > { %1530 = vmatpush3.bf16.msra.mxu1 %v823_v6  ;;  %1531 = vmatprep.mubr.msk.bf16.mxu1 %vm672_vm3, %v1625_v4 }
 0x106   : > { %1568 = vmatprep.subr.msk.bf16.mxu1 %vm679_vm1, %v1415_v7 }
 0x108   : > { %v1628_v11 = vld [vmem:[%s1842_s14 + $0x38] sm:$0xff]  }
 0x10a   : > { %v1627_v8 = vld [vmem:[%s1842_s14 + $0x30] sm:$0xff]   ;;  %s1364_s14 = sshll.u32 %s2019_s26, 2  ;;  %s1358_s26 = sshll.u32 %s339_s25, 2 }
 0x10b   : > { %s1939_s16 = scalar_lea.vmem %s2008_s8, %s1364_s14  ;;  %s1441_s14 = sshll.u32 %s1769_s13, 6 }
 0x10c   : > { %1532 = vmatmul.mubr.msk.bf16.vlgmr.msra.gmra.mxu1 %vm672_vm3, %v1626_v9  ;;  %s341_s23 = scalar_lea.vmem [#allocation2], %s1358_s26  ;;  %s1243_s21 = scalar_lea.hbm %s2009_s9, %s1441_s14 }
 0x10d   : > { %1536 = vmatpush3.bf16.msra.mxu1 %v901_v10  ;;  %1537 = vmatprep.mubr.msk.bf16.mxu1 %vm672_vm3, %v1627_v8  ;;  %v1439_v8 = vld [vmem:[%s2006_s6] ss:$0 sm:$0xff]  ;;  %s1245_s28 = sshll.u32 %s341_s23, 4  ;;  %s1637_s13 = sshll.u32 %s1697_s27, 4  ;;  %s1246_s28 = int_to_ptr.vmem [resolvable:$true] %s1245_s28  ;;  %s1638_s13 = int_to_ptr.vmem [resolvable:$false] %s1637_s13 }
 0x10e   : > { %1541 = vmatprep.subr.bf16.mxu1 %v1695_v13  ;;  %s1633_s24 = scalar_lea.vmem %s1246_s28, 64  ;;  %s1639_s26 = scalar_lea.vmem %s1638_s13, 128 }
 0x10f   : > { %p1634_p12 = scmp.ne.s32.totalorder %s1246_s28, %s1633_s24  ;;  %p1640_p1 = scmp.lt.s32.totalorder %s1246_s28, %s1638_s13 }
 0x110   : > { %p1641_p2 = scmp.lt.s32.totalorder %s1639_s26, %s1633_s24 }
 0x111   : > { %p1635_p13 = pnand %p1634_p12, %p1786_p5 }
 0x112   : > { %p1642_p3 = por %p1641_p2, %p1640_p1 }
 0x113   : > { %p1636_p0 = pneg %p1635_p13 }
 0x114   : > { %1538 = vmatmul.mubr.msk.bf16.vlgmr.msra.gmra.mxu1 %vm672_vm3, %v1628_v11 }
 0x115   : > { %1543 = vmatprep.mubr.msk.bf16.mxu1 %vm1696_vm4, %v1695_v13  ;;  %1542 = vmatpush3.bf16.msra.mxu1 %v1630_v14  ;;  %p1643_p4 = pnand %p1642_p3, %p1636_p0 }
 0x116   : > { %1553 = vmatprep.subr.bf16.mxu1 %v1695_v13 }
 0x1bc   : > { %v1521_v15 = vpop.f32.mrf.mxu1 }
 0x1be   : > { %v717_v16 = vpop.f32.mrf.mxu1 }
 0x1c0   : > { %v1522_v17 = vpop.f32.mrf.mxu1 }
 0x1c2   : > { %v720_v18 = vpop.f32.mrf.mxu1 }
 0x1c4   : > { %v1527_v19 = vpop.f32.mrf.mxu1 }
 0x1c5   : > { %v794_v26 = vadd.f32 %v1527_v19, %v1521_v15 }
 0x1c6   : > { %v785_v20 = vpop.f32.mrf.mxu1 }
 0x1c7   : > { %v786_v28 = vadd.f32 %v785_v20, %v717_v16 }
 0x1c8   : > { %v1528_v21 = vpop.f32.mrf.mxu1 }
 0x1c9   : > { %v797_v32 = vadd.f32 %v1528_v21, %v1522_v17 }
 0x1ca   : > { %v788_v22 = vpop.f32.mrf.mxu1 }
 0x1cb   : > { %v789_v36 = vadd.f32 %v788_v22, %v720_v18 }
 0x1cc   : > { %v1533_v23 = vpop.f32.mrf.mxu1 }
 0x1cd   : > { %v876_v29 = vadd.f32 %v1533_v23, %v794_v26 }
 0x1ce   : > { %v859_v24 = vpop.f32.mrf.mxu1 }
 0x1cf   : > { %v874_v33 = vadd.f32 %v859_v24, %v786_v28 }
 0x1d0   : > { %v1534_v25 = vpop.f32.mrf.mxu1 }
 0x1d1   : > { %v877_v37 = vadd.f32 %v1534_v25, %v797_v32 }
 0x1d2   : > { %v862_v27 = vpop.f32.mrf.mxu1 }
 0x1d3   : > { %v875_v41 = vadd.f32 %v862_v27, %v789_v36 }
 0x1d4   : > { %v1539_v30 = vpop.f32.mrf.mxu1 }
 0x1d5   : > { %v954_v34 = vadd.f32 %v1539_v30, %v876_v29 }
 0x1d6   : > { %v937_v35 = vpop.f32.mrf.mxu1 }
 0x1d7   : > { %v965_v38 = vadd.f32 %v1420_v31, %v954_v34  ;;  %v952_v39 = vadd.f32 %v937_v35, %v874_v33 }
 0x1d8   : > { %v1540_v40 = vpop.f32.mrf.mxu1 }
 0x1d9   : > { %v1462_v42 = vpack.c.bf16 %v965_v38, %v965_v38  ;;  %v963_v43 = vadd.f32 %v1420_v31, %v952_v39  ;;  %v955_v44 = vadd.f32 %v1540_v40, %v877_v37 }
 0x1da   : > { %v940_v45 = vpop.f32.mrf.mxu1 }
 0x1db   : > { %986 = vst.msk [vmem:[%s1939_s16 + $0x8] sm:$0xf] %vm983_vm5, %v1462_v42  ;;  %v1460_v46 = vpack.c.bf16 %v963_v43, %v963_v43  ;;  %v966_v47 = vadd.f32 %v1420_v31, %v955_v44  ;;  %v953_v48 = vadd.f32 %v940_v45, %v875_v41 }
 0x1dd   : > { %984 = vst.msk [vmem:[%s1939_s16] sm:$0xf] %vm983_vm5, %v1460_v46  ;;  %v1463_v49 = vpack.c.bf16 %v966_v47, %v966_v47  ;;  %v964_v50 = vadd.f32 %v1420_v31, %v953_v48 }
 0x1df   : > { %987 = vst.msk [vmem:[%s1939_s16 + $0xc] sm:$0xf] %vm983_vm5, %v1463_v49  ;;  %v1461_v51 = vpack.c.bf16 %v964_v50, %v964_v50 }
 0x1e1   : > { %985 = vst.msk [vmem:[%s1939_s16 + $0x4] sm:$0xf] %vm983_vm5, %v1461_v51 }
 0x1e2   : > { %v1094_v57 = vld [vmem:[%s1939_s16 + $0x8] sm:$0xf] }
 0x1e4   : > { %v988_v53 = vld [vmem:[%s1939_s16] sm:$0xf] }
 0x1e5   : > { %1550 = vmatmul.mubr.msk.bf16.vlgmr.msra.gmra.mxu0 %vm1001_vm6, %v988_v53 }
 0x1e6   : > { %1560 = vmatpush3.bf16.msra.mxu0 %v1632_v52  ;;  %1561 = vmatprep.mubr.msk.bf16.mxu0 %vm1696_vm4, %v1695_v13  ;;  %v1148_v56 = vld [vmem:[%s1939_s16 + $0xc] sm:$0xf] }
 0x1e8   : > { %v991_v55 = vld [vmem:[%s1939_s16 + $0x4] sm:$0xf] }
 0x1e9   : > { %1544 = vmatmul.mubr.msk.bf16.vlgmr.msra.gmra.mxu1 %vm1001_vm6, %v991_v55 }
 0x1ea   : > { %1554 = vmatpush3.bf16.msra.mxu1 %v1631_v54  ;;  %1555 = vmatprep.mubr.msk.bf16.mxu1 %vm1696_vm4, %v1695_v13 }
 0x1ed   : > { %1562 = vmatmul.mubr.msk.bf16.vlgmr.msra.gmra.mxu0 %vm1001_vm6, %v1148_v56 }
 0x1f1   : > { %1556 = vmatmul.mubr.msk.bf16.vlgmr.msra.gmra.mxu1 %vm1001_vm6, %v1094_v57 }
 0x2a5   : > { %v1088_v58 = vpop.f32.mrf.mxu0 }
 0x2a7   : > { %v1551_v59 = vpop.f32.mrf.mxu0 }
 0x2a9   : > { %v1039_v60 = vpop.f32.mrf.mxu1  ;;  %v1091_v61 = vpop.f32.mrf.mxu0 }
 0x2aa   : > { %v1089_v4 = vadd.f32 %v1088_v58, %v1039_v60 }
 0x2ab   : > { %v1545_v62 = vpop.f32.mrf.mxu1  ;;  %v1552_v63 = vpop.f32.mrf.mxu0 }
 0x2ad   : > { %v1042_v0 = vpop.f32.mrf.mxu1  ;;  %v1195_v1 = vpop.f32.mrf.mxu0 }
 0x2af   : > { %v1546_v2 = vpop.f32.mrf.mxu1  ;;  %v1563_v3 = vpop.f32.mrf.mxu0 }
 0x2b1   : > { %v1141_v5 = vpop.f32.mrf.mxu1  ;;  %v1198_v6 = vpop.f32.mrf.mxu0 }
 0x2b2   : > { %v1147_v7 = vadd.f32 %v1141_v5, %v1089_v4 }
 0x2b3   : > { %v1557_v9 = vpop.f32.mrf.mxu1  ;;  %v1564_v10 = vpop.f32.mrf.mxu0 }
 0x2b4   : > { %v1201_v11 = vadd.f32 %v1195_v1, %v1147_v7 }
 0x2b5   : > { %v1144_v12 = vpop.f32.mrf.mxu1 }
 0x2b6   : > { %v1209_v13 = vadd.f32 %v1439_v8, %v1201_v11 }
 0x2b7   : > { %v1558_v14 = vpop.f32.mrf.mxu1 }
 0x2b8   : > { %v1210_v15 = vpack.c.bf16 %v1209_v13, %v1209_v13 }
 0x2ba   : > { %1212 = vst.msk [vmem:[%s341_s23] sm:$0xf] %vm1211_vm7, %v1210_v15 }
 0x2bb   : > { %1646 = shalt.err (!%p1643_p4)
}
 0x2bc   : > { %s1647_s29 = scalar_lea.hbm %s1243_s21, 64  ;;  %s1651_s23 = scalar_lea.hbm %s2009_s9, 256 }
 0x2bd   : > { %p1648_p7 = scmp.ne.s32.totalorder %s1243_s21, %s1647_s29  ;;  %p1652_p10 = scmp.lt.s32.totalorder %s1243_s21, %s2009_s9 }
 0x2be   : > { %p1653_p11 = scmp.lt.s32.totalorder %s1651_s23, %s1647_s29 }
 0x2bf   : > { %p1649_p8 = pnand %p1648_p7, %p1786_p5 }
 0x2c0   : > { %p1654_p12 = por %p1653_p11, %p1652_p10 }
 0x2c1   : > { %p1650_p9 = pneg %p1649_p8 }
 0x2c3   : > { %p1655_p13 = pnand %p1654_p12, %p1650_p9 }
 0x2c5   : > { %1658 = shalt.err (!%p1655_p13)
}
 0x2c6   : > { %1569 = dma.vmem_to_hbm [thread:$0]  (%p1786_p5), %s1246_s28, 64, %s1243_s21, %s1224_s22  }
 0x2c7 PF: > { %p1575_p0 = scmp.ge.s32.totalorder %s1693_s12, 2  ;;  %s1273_s24 = sand.u32 1, %s1681_s30  }
 0x2c8   : > { %s1274_s27 = scalar_lea.sflag [#allocation3], %s1273_s24 }
 0x2c9   : > { %p1572_p1 = pnand %p1575_p0, %p1790_p6 }
 0x2cb   : > { %p1573_p2 = pneg %p1572_p1 }
 0x2cd   : > { %1676 = dma.done.wait (%p1573_p2), %s1274_s27, 64  }
 0x2ce   : > { %1678 = vsyncadd (%p1573_p2), %s1274_s27, 4294967232  ;;  %p20_p3 = scmp.ge.s32.totalorder %s1773_s15, 6   ;;  %s2012_s30 = smov %s1685_s10 }
 0x2cf   : > { %s2013_s10 = smov %s1689_s11  ;;  %s2014_s11 = smov %s1784_s18 }
 0x2d0   : > { %s2015_s12 = smov %s1773_s15  ;;  %22 = sbr.rel (!%p20_p3) target bundleno = 3 (0x3), region = 113 }
 0x2d5   :  { %1279 = vsyncpa [#allocation3], 1 }
 0x2d6   :  { %1281 = vsyncpa [#allocation3 + $0x1], 1 }

</bundles_post_ra>
